<compile_context>
chip_gen: v5e
topology: v5e:2x2
jax: 0.10.0
libtpu: 0.0.40
codegen_flags: <defaults>
</compile_context>

<pallas_src>
import functools
import math

import jax
import jax.numpy as jnp
from jax.experimental import pallas as pl
from jax.experimental.pallas import tpu as pltpu


def _timesteps_kernel(t_ref, o_ref, *, half_dim, log_max_period):
    """o[:, :half] = cos(t * freqs); o[:, half:] = sin(t * freqs)."""
    t = t_ref[...].astype(jnp.float32)                         # (TB, 1)
    # freqs[k] = exp(-ln(10000) * k / half_dim), built on-chip (lane iota + EUP exp).
    k = jax.lax.broadcasted_iota(jnp.int32, (1, half_dim), 1).astype(jnp.float32)
    freqs = jnp.exp(k * (-log_max_period / float(half_dim)))   # (1, half_dim)
    emb = t * freqs                                            # (TB, half_dim)
    # cos first, then sin (matches the PyTorch module's concat order).
    o_ref[:, :half_dim] = jnp.cos(emb)
    o_ref[:, half_dim:] = jnp.sin(emb)


@functools.partial(jax.jit, static_argnames=("num_channels",))
def timesteps_embedding(timesteps, num_channels: int):
    B = timesteps.shape[0]
    half_dim = num_channels // 2
    out_dim = 2 * half_dim
    t2d = timesteps.reshape(B, 1).astype(jnp.float32)

    # Small batches: single full-array block (block_shape == array shape, so no
    # (8,128) constraint).  Large batches: 8-aligned batch tiles, pipelined and
    # shardable across TensorCores.
    if B <= 1024:
        tb = B
    else:
        tb = 512
    grid = (pl.cdiv(B, tb),)

    kernel = functools.partial(
        _timesteps_kernel, half_dim=half_dim, log_max_period=math.log(10000.0)
    )

    return pl.pallas_call(
        kernel,
        out_shape=jax.ShapeDtypeStruct((B, out_dim), jnp.float32),
        grid_spec=pltpu.PrefetchScalarGridSpec(
            num_scalar_prefetch=0,
            grid=grid,
            in_specs=[pl.BlockSpec((tb, 1), lambda i: (i, 0))],
            out_specs=pl.BlockSpec((tb, out_dim), lambda i: (i, 0)),
        ),
        compiler_params=pltpu.CompilerParams(
            dimension_semantics=("parallel",),
        ),
    )(t2d)


class Timesteps:
    """JAX/Pallas port of the PyTorch Timesteps module."""

    def __init__(self, num_channels: int):
        self.num_channels = num_channels

    def __call__(self, timesteps):
        return timesteps_embedding(timesteps, self.num_channels)


def _reference(timesteps, num_channels):
    half_dim = num_channels // 2
    exponent = (-math.log(10000.0)) * jnp.arange(half_dim, dtype=jnp.float32)
    exponent = exponent / float(half_dim)
    freqs = jnp.exp(exponent)
    emb = timesteps[:, None].astype(jnp.float32) * freqs[None, :]
    return jnp.concatenate([jnp.cos(emb), jnp.sin(emb)], axis=-1)


if __name__ == "__main__":
    key = jax.random.PRNGKey(0)
    k1, k2 = jax.random.split(key)

    # Case 1: small batch (single-block path), num_channels = 256 (lane-aligned).
    B, C = 8, 256
    timesteps = jax.random.uniform(k1, (B,), jnp.float32, 0.0, 1000.0)
    mod = Timesteps(C)
    emb = jax.block_until_ready(mod(timesteps))
    ref = _reference(timesteps, C)
    assert emb.shape == (B, C)
    assert emb.dtype == jnp.float32
    assert jnp.allclose(emb, ref, atol=2e-3, rtol=2e-3)

    # Case 2: large batch (tiled batch grid, ragged last tile), int timesteps.
    B2 = 2048 + 40
    timesteps2 = jax.random.randint(k2, (B2,), 0, 1000).astype(jnp.int32)
    emb2 = jax.block_until_ready(mod(timesteps2))
    ref2 = _reference(timesteps2, C)
    assert emb2.shape == (B2, C)
    assert jnp.allclose(emb2, ref2, atol=2e-3, rtol=2e-3)

    print("KERNEL_OK")
</pallas_src>

<mosaic_0001>
module attributes {stable_mosaic.version = 11 : i64} {
  func.func @_timesteps_kernel(%arg0: i32, %arg1: memref<8x1xf32, #tpu.memory_space<vmem>>, %arg2: memref<8x256xf32, #tpu.memory_space<vmem>>) attributes {dimension_semantics = [#tpu.dimension_semantics<parallel>], iteration_bounds = array<i64: 1>, scalar_prefetch = 0 : i64, scratch_operands = 0 : i64, tpu.core_type = #tpu.core_type<tc>, window_params = [{transform_indices = @transform_0, window_bounds = array<i64: 8, 1>}, {transform_indices = @transform_1, window_bounds = array<i64: 8, 256>}]} {
    %c0 = arith.constant 0 : index
    %c0_0 = arith.constant 0 : index
    %0 = vector.load %arg1[%c0, %c0_0] : memref<8x1xf32, #tpu.memory_space<vmem>>, vector<8x1xf32>
    %1 = tpu.iota {dimensions = array<i32: 1>} : vector<1x128xi32>
    %2 = arith.sitofp %1 : vector<1x128xi32> to vector<1x128xf32>
    %cst = arith.constant -0.0719557852 : f32
    %3 = vector.broadcast %cst : f32 to vector<1x128xf32>
    %4 = arith.mulf %2, %3 : vector<1x128xf32>
    %5 = math.exp %4 : vector<1x128xf32>
    %6 = vector.broadcast %0 : vector<8x1xf32> to vector<8x128xf32>
    %7 = vector.broadcast %5 : vector<1x128xf32> to vector<8x128xf32>
    %8 = arith.mulf %6, %7 : vector<8x128xf32>
    %9 = math.cos %8 : vector<8x128xf32>
    %c0_1 = arith.constant 0 : index
    %c0_2 = arith.constant 0 : index
    %10 = vector.load %arg2[%c0_1, %c0_2] : memref<8x256xf32, #tpu.memory_space<vmem>>, vector<8x128xf32>
    tpu.vector_store %arg2[%c0_1, %c0_2], %9 {strides = array<i32>} : memref<8x256xf32, #tpu.memory_space<vmem>>, vector<8x128xf32>,
    %11 = math.sin %8 : vector<8x128xf32>
    %c0_3 = arith.constant 0 : index
    %c128 = arith.constant 128 : index
    %12 = vector.load %arg2[%c0_3, %c128] : memref<8x256xf32, #tpu.memory_space<vmem>>, vector<8x128xf32>
    tpu.vector_store %arg2[%c0_3, %c128], %11 {strides = array<i32>} : memref<8x256xf32, #tpu.memory_space<vmem>>, vector<8x128xf32>,
    return
  }
  func.func @transform_0(%arg0: i32) -> (i32, i32) {
    %c0_i32 = arith.constant 0 : i32
    %c0_i32_0 = arith.constant 0 : i32
    return %arg0, %c0_i32 : i32, i32
  }
  func.func @transform_1(%arg0: i32) -> (i32, i32) {
    %c0_i32 = arith.constant 0 : i32
    %c0_i32_0 = arith.constant 0 : i32
    return %arg0, %c0_i32 : i32, i32
  }
}

</mosaic_0001>

<bundles_post_ra>
// kernel: timesteps_embedding.1
= control target key start
LH: loop header
LB: loop body
LE: loop exit
PB: predicated region body
PF: predicated region fallthrough
CT: control target
= control target key end

     0   :  { %v392_v1 = vmov 0   ;;  %s477_s0 = inlined_call_operand.vmem [shape: f32[8,1], index: 0, kind: input, shape index: {}]   ;;  %s478_s1 = inlined_call_operand.hbm [shape: f32[8,256], index: 1, kind: output, shape index: {}]  }
   0x1   :  { %v9_v0 = vld [vmem:[%s477_s0] sm:$0xff]  ;;  %363 = vset.pattern.permute.xlu0 %v392_v1 }
   0x2   :  { %18 = vperm.xlu0 %363, %v9_v0  }
   0x3   :  { %6 = vsyncpa [#allocation3], 0  ;;  %v10_v2 = vlaneseq  ;;  %v393_v21 = vmov 683565275   ;;  %v394_v23 = vmov 2475754826  }
   0x4   :  { %v395_v26 = vmov 2131351028   ;;  %v396_v29 = vmov 2102212464   ;;  %v397_v32 = vmov 920167782  }
   0x5   :  { %v11_v3 = vand.u32 127, %v10_v2  ;;  %v398_v35 = vmov 1326507024   ;;  %s399_s0 = smov [#allocation2]   ;;  %s340_s11 = sshll.u32 %s478_s1, 4  ;;  %s341_s11 = int_to_ptr.hbm [resolvable:$true] %s340_s11 }
   0x6   :  { %s338_s8 = sshll.u32 %s399_s0, 4  ;;  %s339_s8 = int_to_ptr.vmem [resolvable:$true] %s338_s8 }
   0x7   :  { %v12_v4 = vcvt.s32.f32 %v11_v3 }
   0x9   :  { %v13_v5 = vmul.f32 -0.071955785, %v12_v4 }
   0xb   :  { %v14_v6 = vmul.f32 1.442695, %v13_v5 }
   0xd   :  { %364 = vpow2.f32 %v14_v6 }
  0x13   :  { %v365_v7 = vpop.eup %364 }
  0x74   :  { %v19_v8 = vpop.permute.xlu0 %18 }
  0x75   :  { %v414_v9 = vmul.f32 %v365_v7, %v19_v8 }
  0x77   :  { %v25_v10 = vand.u32 2139095040, %v414_v9  ;;  %v22_v13 = vand.u32 2147483647, %v414_v9  ;;  %vm24_vm12 = vcmp.lt.s32.totalorder %v414_v9, 0 }
  0x79   :  { %v26_v11 = vshrl.u32 %v25_v10, 23  ;;  %v29_v15 = vand.u32 8388607, %v22_v13  ;;  %vm23_vm13 = vcmp.le.f32.partialorder %v22_v13, 0.7853982 }
  0x7b   :  { %v349_v12 = vadd.s32 4294967169, %v26_v11  ;;  %v30_v19 = vor.u32 8388608, %v29_v15 }
  0x7d   :  { %v32_v14 = vadd.s32 1, %v349_v12  ;;  %v431_v42 = vshll.u32 %v30_v19, 8 }
  0x7f   :  { %vm33_vm0 = vcmp.gt.s32.totalorder %v32_v14, 0  ;;  %v71_v51 = vand.u32 65535, %v431_v42  ;;  %v72_v52 = vshrl.u32 %v431_v42, 16 }
  0x80   :  { %v34_v16 = vsel %vm33_vm0, %v32_v14, 0 }
  0x81   :  { %v36_v17 = vand.u32 31, %v34_v16  ;;  %v422_v20 = vshrl.u32 %v34_v16, 5 }
  0x83   :  { %v420_v18 = vsub.s32 32, %v36_v17  ;;  %v39_v22 = vshll.u32 %v393_v21, %v36_v17  ;;  %v42_v24 = vshll.u32 %v394_v23, %v36_v17  ;;  %v45_v28 = vshll.u32 %v395_v26, %v36_v17 }
  0x84   :  { %v48_v31 = vshll.u32 %v396_v29, %v36_v17  ;;  %v51_v34 = vshll.u32 %v397_v32, %v36_v17  ;;  %vm54_vm1 = vcmp.lt.s32.totalorder %v422_v20, 1  ;;  %vm57_vm2 = vcmp.lt.s32.totalorder %v422_v20, 4 }
  0x85   :  { %v40_v25 = vshrl.u32 %v394_v23, %v420_v18  ;;  %v43_v27 = vshrl.u32 %v395_v26, %v420_v18  ;;  %v46_v30 = vshrl.u32 %v396_v29, %v420_v18  ;;  %v49_v33 = vshrl.u32 %v397_v32, %v420_v18 }
  0x86   :  { %v52_v36 = vshrl.u32 %v398_v35, %v420_v18  ;;  %vm56_vm3 = vcmp.lt.s32.totalorder %v422_v20, 3  ;;  %vm55_vm4 = vcmp.lt.s32.totalorder %v422_v20, 2  ;;  %v38_v16 = vshrl.u32 %v393_v21, %v420_v18 }
  0x87   :  { %v41_v37 = vor.u32 %v40_v25, %v39_v22  ;;  %v44_v38 = vor.u32 %v43_v27, %v42_v24  ;;  %v47_v39 = vor.u32 %v46_v30, %v45_v28  ;;  %v50_v40 = vor.u32 %v49_v33, %v48_v31 }
  0x88   :  { %v53_v41 = vor.u32 %v52_v36, %v51_v34 }
  0x89   :  { %v62_v43 = vsel %vm54_vm1, %v41_v37, %v44_v38  ;;  %v66_v44 = vsel %vm54_vm1, %v44_v38, %v47_v39  ;;  %v63_v45 = vsel %vm57_vm2, %v50_v40, 920167782  ;;  %v59_v12 = vsel %vm57_vm2, %v47_v39, 2102212464 }
  0x8a   :  { %v67_v46 = vsel %vm57_vm2, %v53_v41, 1326507024  ;;  %v64_v47 = vsel %vm56_vm3, %v47_v39, %v63_v45  ;;  %v58_v25 = vsel %vm54_vm1, %v38_v16, %v41_v37  ;;  %v60_v26 = vsel %vm56_vm3, %v44_v38, %v59_v12 }
  0x8b   :  { %v68_v48 = vsel %vm56_vm3, %v50_v40, %v67_v46  ;;  %v65_v49 = vsel %vm55_vm4, %v62_v43, %v64_v47  ;;  %v61_v18 = vsel %vm55_vm4, %v58_v25, %v60_v26 }
  0x8c   :  { %v69_v50 = vsel %vm55_vm4, %v66_v44, %v68_v48  ;;  %v95_v55 = vand.u32 65535, %v65_v49  ;;  %v96_v56 = vshrl.u32 %v65_v49, 16  ;;  %v115_v33 = vmul.u32 %v431_v42, %v61_v18 }
  0x8d   :  { %v73_v53 = vand.u32 65535, %v69_v50  ;;  %v74_v54 = vshrl.u32 %v69_v50, 16  ;;  %vm165_vm4 = vweird.f32 %v414_v9 }
  0x8e   :  { %v98_v59 = vmul.u32 %v96_v56, %v71_v51  ;;  %v99_v60 = vmul.u32 %v95_v55, %v72_v52  ;;  %v97_v0 = vmul.u32 %v95_v55, %v71_v51  ;;  %v100_v5 = vmul.u32 %v96_v56, %v72_v52 }
  0x8f   :  { %v76_v57 = vmul.u32 %v74_v54, %v71_v51  ;;  %v77_v58 = vmul.u32 %v73_v53, %v72_v52  ;;  %v75_v61 = vmul.u32 %v73_v53, %v71_v51  ;;  %v78_v63 = vmul.u32 %v74_v54, %v72_v52 }
  0x90   :  { %v101_v2 = vshll.u32 %v98_v59, 16  ;;  %v103_v7 = vshll.u32 %v99_v60, 16  ;;  %v102_v23 = vshrl.u32 %v98_v59, 16  ;;  %v104_v29 = vshrl.u32 %v99_v60, 16 }
  0x91   :  { %v79_v62 = vshll.u32 %v76_v57, 16  ;;  %v81_v3 = vshll.u32 %v77_v58, 16  ;;  %v80_v17 = vshrl.u32 %v76_v57, 16  ;;  %v82_v27 = vshrl.u32 %v77_v58, 16 }
  0x92   :  { %vm105_vm6 = vc.u32 %v97_v0, %v101_v2  ;;  %v107_v8 = vadd.s32 %v101_v2, %v97_v0 }
  0x93   :  { %vm83_vm5 = vc.u32 %v75_v61, %v79_v62  ;;  %v85_v4 = vadd.s32 %v79_v62, %v75_v61  ;;  %v106_v11 = vsel %vm105_vm6, 1, %v392_v1 }
  0x94   :  { %v84_v6 = vsel %vm83_vm5, 1, %v392_v1  ;;  %v108_v15 = vadd.s32 %v106_v11, %v100_v5  ;;  %vm109_vm8 = vc.u32 %v107_v8, %v103_v7  ;;  %v111_v32 = vadd.s32 %v107_v8, %v103_v7 }
  0x95   :  { %v86_v10 = vadd.s32 %v84_v6, %v78_v63  ;;  %vm87_vm7 = vc.u32 %v85_v4, %v81_v3  ;;  %v110_v22 = vsel %vm109_vm8, 1, %v392_v1 }
  0x96   :  { %v88_v14 = vsel %vm87_vm7, 1, %v392_v1  ;;  %v112_v24 = vadd.s32 %v110_v22, %v108_v15 }
  0x97   :  { %v90_v19 = vadd.s32 %v88_v14, %v86_v10 }
  0x98   :  { %v113_v30 = vadd.s32 %v112_v24, %v102_v23 }
  0x99   :  { %v91_v28 = vadd.s32 %v90_v19, %v80_v17 }
  0x9a   :  { %v114_v21 = vadd.s32 %v113_v30, %v104_v29 }
  0x9b   :  { %v92_v31 = vadd.s32 %v91_v28, %v82_v27 }
  0x9c   :  { %v118_v1 = vadd.s32 1, %v114_v21 }
  0x9d   :  { %vm117_vm9 = vc.u32 %v92_v31, %v111_v32  ;;  %v116_v20 = vadd.s32 %v111_v32, %v92_v31 }
  0x9e   :  { %v119_v34 = vsel %vm117_vm9, %v118_v1, %v114_v21 }
  0x9f   :  { %v120_v35 = vadd.s32 %v119_v34, %v115_v33 }
  0xa1   :  { %v121_v36 = vadd.s32 536870912, %v120_v35 }
  0xa3   :  { %v122_v37 = vshrl.u32 %v121_v36, 30 }
  0xa5   :  { %v123_v39 = vshll.u32 %v122_v37, 30  ;;  %v146_v58 = vsub.s32 4, %v122_v37 }
  0xa7   :  { %v124_v38 = vsub.s32 %v120_v35, %v123_v39  ;;  %v147_v63 = vsel %vm24_vm12, %v146_v58, %v122_v37 }
  0xa8   :  { %v149_v3 = vsel %vm23_vm13, 0, %v147_v63 }
  0xa9   :  { %vm125_vm10 = vcmp.lt.s32.totalorder %v124_v38, 0  ;;  %v126_v40 = vsub.s32 0, %v124_v38  ;;  %v321_v8 = vadd.s32 3, %v149_v3  ;;  %v166_v14 = vand.u32 3, %v149_v3 }
  0xab   :  { %v127_v41 = vsel %vm125_vm10, %v126_v40, %v124_v38  ;;  %v322_v15 = vand.u32 3, %v321_v8  ;;  %vm167_vm14 = vcmp.lt.s32.totalorder %v166_v14, 2  ;;  %vm168_vm15 = vcmp.eq.s32.totalorder %v166_v14, 0 }
  0xac   :  { %v128_v43 = vclz %v127_v41  ;;  %vm171_vm0 = vcmp.eq.s32.totalorder %v166_v14, 2 }
  0xad   :  { %vm323_vm1 = vcmp.lt.s32.totalorder %v322_v15, 2  ;;  %vm324_vm2 = vcmp.eq.s32.totalorder %v322_v15, 0  ;;  %vm327_vm3 = vcmp.eq.s32.totalorder %v322_v15, 2 }
  0xae   :  { %v350_v44 = vadd.s32 4294967294, %v128_v43 }
  0xb0   :  { %vm351_vm11 = vcmp.lt.s32.totalorder %v350_v44, 0 }
  0xb1   :  { %v131_v45 = vsel %vm351_vm11, 0, %v350_v44 }
  0xb2   :  { %v132_v46 = vsub.s32 32, %v131_v45  ;;  %v136_v47 = vsub.s32 4294967266, %v131_v45  ;;  %v133_v48 = vshll.u32 %v124_v38, %v131_v45 }
  0xb4   :  { %v134_v49 = vshrl.u32 %v116_v20, %v132_v46  ;;  %v137_v50 = vadd.s32 127, %v136_v47 }
  0xb6   :  { %v135_v42 = vor.u32 %v134_v49, %v133_v48  ;;  %v138_v51 = vshll.u32 %v137_v50, 23 }
  0xb8   :  { %v139_v52 = vor.u32 4788187, %v138_v51  ;;  %v142_v54 = vcvt.s32.f32 %v135_v42 }
  0xba   :  { %v140_v53 = vand.u32 2147483647, %v139_v52 }
  0xbc   :  { %v143_v55 = vmul.f32 %v142_v54, %v140_v53 }
  0xbe   :  { %v144_v56 = vxor.u32 2147483648, %v143_v55 }
  0xc0   :  { %v145_v57 = vsel %vm24_vm12, %v144_v56, %v143_v55 }
  0xc1   :  { %v148_v59 = vsel %vm23_vm13, %v414_v9, %v145_v57 }
  0xc2   :  { %v150_v60 = vmul.f32 %v148_v59, %v148_v59 }
  0xc4   :  { %v151_v61 = vmul.f32 -0.001358992, %v150_v60  ;;  %v158_v62 = vmul.f32 -0.00019511016, %v150_v60 }
  0xc6   :  { %v152_v0 = vadd.f32 0.041655596, %v151_v61  ;;  %v159_v2 = vadd.f32 0.008332121, %v158_v62 }
  0xc8   :  { %v153_v4 = vmul.f32 %v152_v0, %v150_v60  ;;  %v160_v5 = vmul.f32 %v159_v2, %v150_v60 }
  0xca   :  { %v154_v6 = vadd.f32 -0.4999988, %v153_v4  ;;  %v161_v7 = vadd.f32 -0.16666654, %v160_v5 }
  0xcc   :  { %v155_v10 = vmul.f32 %v154_v6, %v150_v60  ;;  %v162_v11 = vmul.f32 %v161_v7, %v150_v60 }
  0xce   :  { %v156_v12 = vadd.f32 1.0, %v155_v10  ;;  %v163_v13 = vadd.f32 1.0, %v162_v11 }
  0xd0   :  { %v164_v16 = vmul.f32 %v163_v13, %v148_v59  ;;  %v172_v17 = vxor.u32 2147483648, %v156_v12 }
  0xd2   :  { %v169_v19 = vxor.u32 2147483648, %v164_v16  ;;  %v173_v23 = vsel %vm171_vm0, %v172_v17, %v164_v16  ;;  %v329_v25 = vsel %vm327_vm3, %v172_v17, %v164_v16 }
  0xd4   :  { %v170_v22 = vsel %vm168_vm15, %v156_v12, %v169_v19  ;;  %v326_v24 = vsel %vm324_vm2, %v156_v12, %v169_v19 }
  0xd5   :  { %v174_v26 = vsel %vm167_vm14, %v170_v22, %v173_v23  ;;  %v330_v27 = vsel %vm323_vm1, %v326_v24, %v329_v25 }
  0xd6   :  { %v175_v28 = vsel %vm165_vm4, nan, %v174_v26  ;;  %v331_v29 = vsel %vm165_vm4, nan, %v330_v27 }
  0xd7   :  { %176 = vst [vmem:[#allocation2] sm:$0xff] %v175_v28 }
  0xd8   :  { %332 = vst [vmem:[#allocation2 + $0x8] sm:$0xff] %v331_v29 }
  0xd9   :  { %343 = dma.vmem_to_hbm [thread:$0]  %s339_s8, 256, %s341_s11, [#allocation3]  }
  0xda   :  { %390 = dma.done.wait [#allocation3], 256  }
  0xdb   :  { %391 = vsyncadd [#allocation3], 4294967040 }
  0xdc   :  { %348 = vsyncpa [#allocation3], 1 }

</bundles_post_ra>
